<compile_context>
chip_gen: v7x
topology: tpu7x:2x2x1
jax: 0.10.0
libtpu: 0.0.40
codegen_flags: <defaults>
</compile_context>

<pallas_src>
import functools

import jax
import jax.numpy as jnp
from jax import lax
from jax.experimental import pallas as pl
from jax.experimental.pallas import tpu as pltpu

EPS = 1e-15        # PoincareManifold.eps
PROJ_EPS = 1e-5    # PoincareManifold.projection_eps
NEG_INF = -1e30


# ---------- Poincare-ball helpers ----------
# _log_map_zero / _exp_map_zero are pure jnp/lax (usable in-kernel and for the tiny
# host-side bias hoist).  sqrt/divide replaced by rsqrt + multiplies (EUP-friendly).

def _log_map_zero(y):
    d = y + EPS
    n2 = jnp.sum(d * d, axis=-1, keepdims=True)
    inv_n = lax.rsqrt(n2)
    n = n2 * inv_n
    nc = jnp.clip(n, EPS, 1.0 - EPS)
    atanh = 0.5 * jnp.log((1.0 + nc) / (1.0 - nc))
    return (atanh * inv_n) * d


def _exp_map_zero(v):
    d = v + EPS
    n2 = jnp.sum(d * d, axis=-1, keepdims=True)
    inv_n = lax.rsqrt(n2)
    n = n2 * inv_n
    return (jnp.tanh(n) * inv_n) * d


def _hyperbolic_projection(x):        # kernel-only (pl.reciprocal)
    n = jnp.sqrt(jnp.sum(x * x, axis=-1, keepdims=True))
    scale = jnp.minimum(1.0, (1.0 - PROJ_EPS) * pl.reciprocal(n + EPS, approx=True))
    return x * scale


def _mobius_addition(u, v):           # kernel-only (pl.reciprocal)
    u2 = jnp.sum(u * u, axis=-1, keepdims=True)
    v2 = jnp.sum(v * v, axis=-1, keepdims=True)
    uv = jnp.sum(u * v, axis=-1, keepdims=True)
    denom = 1.0 + 2.0 * uv + u2 * v2
    num = (1.0 + 2.0 * uv + v2) * u + (1.0 - u2) * v
    return num * pl.reciprocal(denom + EPS, approx=True)


# ---------- kernel 1: entity log-map + linear map (tiled over entity rows) ----------

def ent_map_kernel(ents_ref, w_ref, mapped_ref):
    tan = _log_map_zero(ents_ref[...])                                # f32 elementwise
    mapped_ref[...] = jnp.dot(tan.astype(jnp.bfloat16), w_ref[...],
                              preferred_element_type=jnp.float32).astype(jnp.bfloat16)


# ---------- kernel 2: relation log-map + linear map + relation output ----------

def rel_map_kernel(rels_ref, w_ref, mapped_ref, out_ref):
    tan = _log_map_zero(rels_ref[...])
    mapped_ref[...] = jnp.dot(tan.astype(jnp.bfloat16), w_ref[...],
                              preferred_element_type=jnp.float32).astype(jnp.bfloat16)
    # rels_near_rels: incident-entity degree / count cancels -> identity on the tangent
    # embedding; projection after exp_map_zero is identity up to PROJ_EPS (dropped).
    out_ref[...] = _exp_map_zero(tan)


# ---------- kernel 3: masked online-softmax attention + combine (flash pattern) ----------

def attn_combine_kernel(q_ref, kv_ref, adj_e_ref, adj_r_ref, rels_map_ref,
                        ent_rel_num_ref, bias_ref, out_ref,
                        m_sc, l_sc, acc_sc, *, combine_rels_weight):
    f32 = jnp.float32
    ki = pl.program_id(1)

    @pl.when(ki == 0)
    def _():
        m_sc[...] = jnp.full_like(m_sc, NEG_INF)
        l_sc[...] = jnp.zeros_like(l_sc)
        acc_sc[...] = jnp.zeros_like(acc_sc)

    mask = adj_e_ref[...] > 0
    # scores: contract the feature dim of both bf16 operands directly on the MXU
    # (no in-kernel transpose / XLU vxpose), f32 accumulation.
    s = lax.dot_general(q_ref[...], kv_ref[...],
                        (((1,), (1,)), ((), ())),
                        preferred_element_type=f32)
    s = jnp.where(mask, s, NEG_INF)

    m_prev = m_sc[...]
    m_new = jnp.maximum(m_prev, jnp.max(s, axis=1, keepdims=True))
    a = jnp.exp(m_prev - m_new)
    # where-guard keeps masked entries exactly 0 even when a whole row of this kv
    # tile is masked (no bool->f32 cast / extra multiply).
    p = jnp.where(mask, jnp.exp(s - m_new), 0.0)
    l_sc[...] = a * l_sc[...] + jnp.sum(p, axis=1, keepdims=True)
    acc_sc[...] = a * acc_sc[...] + jnp.dot(p.astype(jnp.bfloat16), kv_ref[...],
                                            preferred_element_type=f32)
    m_sc[...] = m_new

    @pl.when(ki == pl.num_programs(1) - 1)
    def _():
        inv_l = pl.reciprocal(l_sc[...] + EPS, approx=True)
        ents_near_ents = _exp_map_zero(acc_sc[...] * inv_l)

        # entity <- relation neighbourhood mean (bf16 adjacency & values, f32 acc)
        agg = jnp.dot(adj_r_ref[...], rels_map_ref[...], preferred_element_type=f32)
        agg = agg * pl.reciprocal(ent_rel_num_ref[...], approx=True)
        ents_near_rels = _exp_map_zero(agg)

        out = _hyperbolic_projection(
            _mobius_addition(ents_near_ents, combine_rels_weight * ents_near_rels))
        bias_b = jnp.broadcast_to(bias_ref[...], out.shape)
        out = _hyperbolic_projection(_mobius_addition(out, bias_b))
        out_ref[...] = out


# ---------- wrapper ----------

def _round_up(x, m):
    return ((x + m - 1) // m) * m


def _pad2(x, rows, cols):
    pr, pc = rows - x.shape[0], cols - x.shape[1]
    if pr or pc:
        x = jnp.pad(x, ((0, pr), (0, pc)))
    return x


def gat_layer_forward(ents_embed, rels_embed, w_ent, w_rel,
                      near_ents_adj, near_rels_adj,
                      ents_near_rels_num, rels_near_ents_num, bias_vec,
                      combine_rels_weight=0.1):
    # rels_near_ents_num is accepted for API parity but is redundant: the per-relation
    # incident-entity degree equals that count, so the division cancels (see kernel 2).
    del rels_near_ents_num

    f32, bf16 = jnp.float32, jnp.bfloat16
    E, D = ents_embed.shape
    R = rels_embed.shape[0]

    # lane-dense feature dim; modest tiles sized for v7x's 64 MiB VMEM as well
    Dp = _round_up(max(D, 128), 128)
    tq = min(_round_up(E, 8), 256)
    Ep = _round_up(E, tq)
    tr = min(_round_up(R, 8), 256)
    Rp = _round_up(R, tr)
    tk = tq

    ents_p = _pad2(ents_embed.astype(f32), Ep, Dp)
    rels_p = _pad2(rels_embed.astype(f32), Rp, Dp)
    w_ent_p = _pad2(w_ent.astype(f32), Dp, Dp).astype(bf16)
    w_rel_p = _pad2(w_rel.astype(f32), Dp, Dp).astype(bf16)
    # 0/1 adjacencies are exact in bf16 -> halves the dominant HBM->VMEM traffic
    adj_e_p = _pad2(near_ents_adj.astype(f32), Ep, Ep).astype(bf16)
    adj_r_p = _pad2(near_rels_adj.astype(f32), Ep, Rp).astype(bf16)

    cnt = ents_near_rels_num.astype(f32).reshape(E, 1)
    if Ep > E:
        cnt = jnp.concatenate([cnt, jnp.ones((Ep - E, 1), f32)], axis=0)

    # bias exp-map hoisted out of the kernel (computed once, not per grid step)
    bias_h = _exp_map_zero(_pad2(bias_vec.astype(f32).reshape(1, -1), 1, Dp))

    cp_par = pltpu.CompilerParams(dimension_semantics=("parallel",))

    ents_mapped = pl.pallas_call(
        ent_map_kernel,
        out_shape=jax.ShapeDtypeStruct((Ep, Dp), bf16),
        grid=(Ep // tq,),
        in_specs=[pl.BlockSpec((tq, Dp), lambda i: (i, 0)),
                  pl.BlockSpec((Dp, Dp), lambda i: (0, 0))],
        out_specs=pl.BlockSpec((tq, Dp), lambda i: (i, 0)),
        compiler_params=cp_par,
    )(ents_p, w_ent_p)

    rels_mapped, rels_out = pl.pallas_call(
        rel_map_kernel,
        out_shape=(jax.ShapeDtypeStruct((Rp, Dp), bf16),
                   jax.ShapeDtypeStruct((Rp, Dp), f32)),
        grid=(Rp // tr,),
        in_specs=[pl.BlockSpec((tr, Dp), lambda i: (i, 0)),
                  pl.BlockSpec((Dp, Dp), lambda i: (0, 0))],
        out_specs=(pl.BlockSpec((tr, Dp), lambda i: (i, 0)),
                   pl.BlockSpec((tr, Dp), lambda i: (i, 0))),
        compiler_params=cp_par,
    )(rels_p, w_rel_p)

    kernel = functools.partial(attn_combine_kernel,
                               combine_rels_weight=float(combine_rels_weight))
    ents_out = pl.pallas_call(
        kernel,
        out_shape=jax.ShapeDtypeStruct((Ep, Dp), f32),
        grid_spec=pltpu.PrefetchScalarGridSpec(
            num_scalar_prefetch=0,
            grid=(Ep // tq, Ep // tk),
            in_specs=[pl.BlockSpec((tq, Dp), lambda qi, ki: (qi, 0)),    # q tile
                      pl.BlockSpec((tk, Dp), lambda qi, ki: (ki, 0)),    # kv tile
                      pl.BlockSpec((tq, tk), lambda qi, ki: (qi, ki)),   # adj_e tile
                      pl.BlockSpec((tq, Rp), lambda qi, ki: (qi, 0)),    # adj_r q rows
                      pl.BlockSpec((Rp, Dp), lambda qi, ki: (0, 0)),     # rels_mapped
                      pl.BlockSpec((tq, 1), lambda qi, ki: (qi, 0)),     # counts
                      pl.BlockSpec((1, Dp), lambda qi, ki: (0, 0))],     # bias_h
            out_specs=pl.BlockSpec((tq, Dp), lambda qi, ki: (qi, 0)),
            scratch_shapes=[pltpu.VMEM((tq, 1), f32),     # m (running max)
                            pltpu.VMEM((tq, 1), f32),     # l (running denom)
                            pltpu.VMEM((tq, Dp), f32)]),  # acc
        compiler_params=pltpu.CompilerParams(
            dimension_semantics=("parallel", "arbitrary")),   # q tiles across v7x cores
    )(ents_mapped, ents_mapped, adj_e_p, adj_r_p, rels_mapped, cnt, bias_h)

    return ents_out[:E, :D], rels_out[:R, :D]


if __name__ == "__main__":
    E, R, D = 16, 8, 32   # n_entities, n_rels, input_dim == output_dim

    key = jax.random.PRNGKey(0)
    k1, k2, k3, k4 = jax.random.split(key, 4)

    # Hyperbolic input embeddings (inside the unit ball).
    ents_embed = 0.3 * jax.random.normal(k1, (E, D), dtype=jnp.float32)
    ents_embed = ents_embed / (1.0 + jnp.linalg.norm(ents_embed, axis=-1, keepdims=True))
    rels_embed = 0.3 * jax.random.normal(k2, (R, D), dtype=jnp.float32)
    rels_embed = rels_embed / (1.0 + jnp.linalg.norm(rels_embed, axis=-1, keepdims=True))

    # Xavier-uniform weights (deterministic).
    limit = (6.0 / (D + D)) ** 0.5
    w_ent = jax.random.uniform(k3, (D, D), jnp.float32, minval=-limit, maxval=limit)
    w_rel = jax.random.uniform(k4, (D, D), jnp.float32, minval=-limit, maxval=limit)
    bias_vec = jnp.zeros((1, D), jnp.float32)

    # Deterministic dense 0/1 adjacencies with self-loops / non-empty rows+cols.
    ei = jnp.arange(E)
    ri = jnp.arange(R)
    near_ents_adj = ((ei[:, None] + ei[None, :]) % 3 == 0).astype(jnp.float32)
    near_ents_adj = jnp.maximum(near_ents_adj, jnp.eye(E, dtype=jnp.float32))
    near_rels_adj = ((ei[:, None] + 2 * ri[None, :]) % 4 == 0).astype(jnp.float32)
    self_link = (ri[None, :] == (ei % R)[:, None]).astype(jnp.float32)
    near_rels_adj = jnp.maximum(near_rels_adj, self_link)

    ents_near_rels_num = jnp.sum(near_rels_adj, axis=1, keepdims=True)   # (E, 1)
    rels_near_ents_num = jnp.sum(near_rels_adj, axis=0)[:, None]          # (R, 1)

    ents_out, rels_out = gat_layer_forward(
        ents_embed, rels_embed, w_ent, w_rel,
        near_ents_adj, near_rels_adj,
        ents_near_rels_num, rels_near_ents_num, bias_vec,
        combine_rels_weight=0.1)

    jax.block_until_ready((ents_out, rels_out))
    assert ents_out.shape == (E, D) and rels_out.shape == (R, D)
    assert bool(jnp.all(jnp.isfinite(ents_out))) and bool(jnp.all(jnp.isfinite(rels_out)))
    print("KERNEL_OK")
</pallas_src>

<mosaic_0001>
module attributes {stable_mosaic.version = 11 : i64} {
  func.func @ent_map_kernel(%arg0: i32, %arg1: memref<16x128xf32, #tpu.memory_space<vmem>>, %arg2: memref<128x128xbf16, #tpu.memory_space<vmem>>, %arg3: memref<16x128xbf16, #tpu.memory_space<vmem>>) attributes {dimension_semantics = [#tpu.dimension_semantics<parallel>], iteration_bounds = array<i64: 1>, scalar_prefetch = 0 : i64, scratch_operands = 0 : i64, tpu.core_type = #tpu.core_type<tc>, window_params = [{transform_indices = @transform_0, window_bounds = array<i64: 16, 128>}, {pipeline_mode = #tpu.pipeline_mode<synchronous>, transform_indices = @transform_1, window_bounds = array<i64: 128, 128>}, {transform_indices = @transform_2, window_bounds = array<i64: 16, 128>}]} {
    %c0 = arith.constant 0 : index
    %c0_0 = arith.constant 0 : index
    %0 = vector.load %arg1[%c0, %c0_0] : memref<16x128xf32, #tpu.memory_space<vmem>>, vector<16x128xf32>
    %cst = arith.constant 1.000000e-15 : f32
    %1 = vector.broadcast %cst : f32 to vector<16x128xf32>
    %2 = arith.addf %0, %1 : vector<16x128xf32>
    %3 = arith.mulf %2, %2 : vector<16x128xf32>
    %cst_1 = arith.constant dense<0.000000e+00> : vector<16xf32>
    %4 = vector.multi_reduction <add>, %3, %cst_1 [1] : vector<16x128xf32> to vector<16xf32>
    %5 = vector.shape_cast %4 : vector<16xf32> to vector<16x1xf32>
    %6 = math.rsqrt %5 : vector<16x1xf32>
    %7 = arith.mulf %5, %6 : vector<16x1xf32>
    %cst_2 = arith.constant 1.000000e-15 : f32
    %cst_3 = arith.constant 1.000000e+00 : f32
    %8 = vector.broadcast %cst_2 : f32 to vector<16x1xf32>
    %9 = arith.maximumf %8, %7 : vector<16x1xf32>
    %10 = vector.broadcast %cst_3 : f32 to vector<16x1xf32>
    %11 = arith.minimumf %10, %9 : vector<16x1xf32>
    %cst_4 = arith.constant 1.000000e+00 : f32
    %12 = vector.broadcast %cst_4 : f32 to vector<16x1xf32>
    %13 = arith.addf %12, %11 : vector<16x1xf32>
    %cst_5 = arith.constant 1.000000e+00 : f32
    %14 = vector.broadcast %cst_5 : f32 to vector<16x1xf32>
    %15 = arith.subf %14, %11 : vector<16x1xf32>
    %16 = arith.divf %13, %15 : vector<16x1xf32>
    %17 = math.log %16 : vector<16x1xf32>
    %cst_6 = arith.constant 5.000000e-01 : f32
    %18 = vector.broadcast %cst_6 : f32 to vector<16x1xf32>
    %19 = arith.mulf %18, %17 : vector<16x1xf32>
    %20 = arith.mulf %19, %6 : vector<16x1xf32>
    %21 = vector.broadcast %20 : vector<16x1xf32> to vector<16x128xf32>
    %22 = arith.mulf %21, %2 : vector<16x128xf32>
    %23 = arith.truncf %22 : vector<16x128xf32> to vector<16x128xbf16>
    %c0_7 = arith.constant 0 : index
    %c0_8 = arith.constant 0 : index
    %24 = vector.load %arg2[%c0_7, %c0_8] : memref<128x128xbf16, #tpu.memory_space<vmem>>, vector<128x128xbf16>
    %cst_9 = arith.constant dense<0.000000e+00> : vector<16x128xf32>
    %25 = tpu.matmul %23, %24, %cst_9 {dimension_numbers = #tpu.dot_dimension_numbers<[1], [0], [0], [1], [0, 0, 1, 1], [], []>} : vector<16x128xbf16>, vector<128x128xbf16>, vector<16x128xf32> -> vector<16x128xf32>
    %26 = arith.truncf %25 : vector<16x128xf32> to vector<16x128xbf16>
    %c0_10 = arith.constant 0 : index
    %c0_11 = arith.constant 0 : index
    %27 = vector.load %arg3[%c0_10, %c0_11] : memref<16x128xbf16, #tpu.memory_space<vmem>>, vector<16x128xbf16>
    tpu.vector_store %arg3[%c0_10, %c0_11], %26 {strides = array<i32>} : memref<16x128xbf16, #tpu.memory_space<vmem>>, vector<16x128xbf16>,
    return
  }
  func.func @transform_0(%arg0: i32) -> (i32, i32) {
    %c0_i32 = arith.constant 0 : i32
    %c0_i32_0 = arith.constant 0 : i32
    return %arg0, %c0_i32 : i32, i32
  }
  func.func @transform_1(%arg0: i32) -> (i32, i32) {
    %c0_i32 = arith.constant 0 : i32
    %c0_i32_0 = arith.constant 0 : i32
    %c0_i32_1 = arith.constant 0 : i32
    return %c0_i32, %c0_i32_0 : i32, i32
  }
  func.func @transform_2(%arg0: i32) -> (i32, i32) {
    %c0_i32 = arith.constant 0 : i32
    %c0_i32_0 = arith.constant 0 : i32
    return %arg0, %c0_i32 : i32, i32
  }
}

</mosaic_0001>

<bundles_post_ra>
// kernel: tpu_custom_call.1
= control target key start
LH: loop header
LB: loop body
LE: loop exit
PB: predicated region body
PF: predicated region fallthrough
CT: control target
= control target key end

     0   :  { %7 = vsyncpa [#allocation3], 0  ;;  %s434_s0 = inlined_call_operand.hbm [shape: f32[16,128], index: 0, kind: input, shape index: {}]   ;;  %s435_s1 = inlined_call_operand.hbm [shape: bf16[128,128], index: 1, kind: input, shape index: {}]   ;;  %s436_s2 = inlined_call_operand.hbm [shape: bf16[16,128], index: 2, kind: output, shape index: {}]  }
   0x1   :  { %8 = vsyncpa [#allocation6], 0 }
   0x2   :  { %9 = vsyncpa [#allocation4], 0  ;;  %s358_s9 = smov [#allocation2]   ;;  %s286_s13 = scalar_lea.hbm %s434_s0, 256 }
   0x3   :  { %s15_s10 = sshll.u32 %s358_s9, 4  ;;  %p287_p0 = scmp.ne.s32.totalorder %s434_s0, %s286_s13  ;;  %s16_s10 = int_to_ptr.vmem [resolvable:$true] %s15_s10 }
   0x4   :  { %p290_p1 = scmp.lt.u32.totalorder %s286_s13, %s434_s0 }
   0x6   :  { %p292_p2 = pnand %p290_p1, %p287_p0 }
   0x8   :  { %295 = shalt.err (!%p292_p2)
}
   0x9   :  { %s296_s18 = scalar_lea.vmem %s16_s10, 256  ;;  %p301_p4 = scmp.lt.s32.totalorder %s16_s10, %s16_s10 }
   0xa   :  { %p297_p3 = scmp.ne.s32.totalorder %s16_s10, %s296_s18  ;;  %p302_p5 = scmp.lt.s32.totalorder %s296_s18, %s296_s18 }
   0xc   :  { %p303_p6 = por %p302_p5, %p301_p4 }
   0xe   :  { %p304_p7 = pnand %p303_p6, %p297_p3 }
  0x10   :  { %307 = shalt.err (!%p304_p7)
}
  0x11   :  { %s359_s19 = smov 128   ;;  %s360_s20 = smov 8  }
  0x12   :  { %21 = dma.hbm_to_vmem [thread:$0]  %s434_s0, 256, %s16_s10, [#allocation3], %s359_s19, %s359_s19, %s360_s20  }
  0x13   :  { %s361_s23 = smov [#allocation5]   ;;  %s308_s27 = scalar_lea.hbm %s435_s1, 1024 }
  0x14   :  { %s27_s24 = sshll.u32 %s361_s23, 4  ;;  %p309_p8 = scmp.ne.s32.totalorder %s435_s1, %s308_s27  ;;  %s28_s24 = int_to_ptr.vmem [resolvable:$true] %s27_s24 }
  0x15   :  { %p312_p9 = scmp.lt.u32.totalorder %s308_s27, %s435_s1 }
  0x17   :  { %p314_p10 = pnand %p312_p9, %p309_p8 }
  0x19   :  { %317 = shalt.err (!%p314_p10)
}
  0x1a   :  { %s318_s4 = scalar_lea.vmem %s28_s24, 1024  ;;  %p323_p12 = scmp.lt.s32.totalorder %s28_s24, %s28_s24 }
  0x1b   :  { %p319_p11 = scmp.ne.s32.totalorder %s28_s24, %s318_s4  ;;  %p324_p13 = scmp.lt.s32.totalorder %s318_s4, %s318_s4 }
  0x1d   :  { %p325_p0 = por %p324_p13, %p323_p12 }
  0x1f   :  { %p326_p1 = pnand %p325_p0, %p319_p11 }
  0x21   :  { %329 = shalt.err (!%p326_p1)
}
  0x22   :  { %s362_s0 = smov 64   ;;  %s363_s5 = smov 4  }
  0x23   :  { %33 = dma.hbm_to_vmem [thread:$0]  %s435_s1, 1024, %s28_s24, [#allocation6], %s362_s0, %s362_s0, %s363_s5  }
  0x24   :  { %352 = dma.done.wait [#allocation3], 256  }
  0x25   :  { %353 = vsyncadd [#allocation3], 4294967040 }
  0x26   :  { %354 = dma.done.wait [#allocation6], 1024  }
  0x27   :  { %355 = vsyncadd [#allocation6], 4294966272  ;;  %v41_v0 = vld [vmem:[#allocation2] sm:$0xff]  ;;  %v42_v1 = vld [vmem:[#allocation2 + $0x8] sm:$0xff]  ;;  %v364_v7 = vmov 0.0   ;;  %vm365_vm0 = vmmov 0  }
  0x28   :  { %v409_v2 = vadd.f32 1e-15, %v41_v0  ;;  %v411_v3 = vadd.f32 1e-15, %v42_v1  ;;  %v266_v6 = vld [vmem:[#allocation5] sm:$0xff]   ;;  %237 = vmatprep.subr.bf16.mxu0 %v364_v7  ;;  %v267_v8 = vld [vmem:[#allocation5 + $0x8] sm:$0xff]   ;;  %253 = vmatprep.mubr.msk.bf16.mxu0 %vm365_vm0, %v364_v7 }
  0x29   :  { %238 = vmatpush3.bf16.msra.mxu0 %v266_v6  ;;  %v268_v9 = vld [vmem:[#allocation5 + $0x10] sm:$0xff]   ;;  %v269_v10 = vld [vmem:[#allocation5 + $0x18] sm:$0xff]   ;;  %v270_v11 = vld [vmem:[#allocation5 + $0x20] sm:$0xff]   ;;  %s366_s1 = smov [#allocation7]  }
  0x2a   :  { %v45_v4 = vmul.f32 %v409_v2, %v409_v2  ;;  %v46_v5 = vmul.f32 %v411_v3, %v411_v3  ;;  %239 = vmatprep.subr.bf16.mxu0 %v364_v7  ;;  %v271_v12 = vld [vmem:[#allocation5 + $0x28] sm:$0xff]   ;;  %v272_v13 = vld [vmem:[#allocation5 + $0x30] sm:$0xff]   ;;  %v273_v14 = vld [vmem:[#allocation5 + $0x38] sm:$0xff]   ;;  %s198_s8 = sshll.u32 %s366_s1, 4  ;;  %s199_s8 = int_to_ptr.vmem [resolvable:$true] %s198_s8 }
  0x2b   :  { %s330_s9 = scalar_lea.vmem %s199_s8, 128  ;;  %p335_p3 = scmp.lt.s32.totalorder %s199_s8, %s199_s8 }
  0x2c   :  { %47 = vadd.xlane.f32.xlu0 %v45_v4  ;;  %p331_p2 = scmp.ne.s32.totalorder %s199_s8, %s330_s9  ;;  %p336_p4 = scmp.lt.s32.totalorder %s330_s9, %s330_s9 }
  0x2d   :  { %240 = vmatpush3.bf16.msra.mxu0 %v267_v8 }
  0x2e   :  { %241 = vmatprep.subr.bf16.mxu0 %v364_v7  ;;  %p337_p5 = por %p336_p4, %p335_p3 }
  0x30   :  { %49 = vadd.xlane.f32.xlu0 %v46_v5  ;;  %p338_p6 = pnand %p337_p5, %p331_p2 }
  0x31   :  { %242 = vmatpush3.bf16.msra.mxu0 %v268_v9 }
  0x32   :  { %243 = vmatprep.subr.bf16.mxu0 %v364_v7 }
  0x35   :  { %244 = vmatpush3.bf16.msra.mxu0 %v269_v10 }
  0x36   :  { %245 = vmatprep.subr.bf16.mxu0 %v364_v7 }
  0x39   :  { %246 = vmatpush3.bf16.msra.mxu0 %v270_v11 }
  0x3a   :  { %247 = vmatprep.subr.bf16.mxu0 %v364_v7 }
  0x3d   :  { %248 = vmatpush3.bf16.msra.mxu0 %v271_v12 }
  0x3e   :  { %249 = vmatprep.subr.bf16.mxu0 %v364_v7 }
  0x41   :  { %250 = vmatpush3.bf16.msra.mxu0 %v272_v13 }
  0x42   :  { %251 = vmatprep.subr.bf16.mxu0 %v364_v7 }
  0x45   :  { %252 = vmatpush3.bf16.msra.mxu0 %v273_v14 }
  0xb9   :  { %v48_v15 = vpop.xlane.xlu0 %47 }
  0xba   :  { %274 = vrsqrt.f32 %v48_v15 }
  0xbd   :  { %v50_v16 = vpop.xlane.xlu0 %49 }
  0xbe   :  { %276 = vrsqrt.f32 %v50_v16 }
  0xc4   :  { %v275_v17 = vpop.eup %274 }
  0xc5   :  { %v53_v18 = vmul.f32 %v275_v17, %v48_v15 }
  0xc7   :  { %v55_v19 = vmax.f32 %v53_v18, 1e-15 }
  0xc8   :  { %v277_v20 = vpop.eup %276 }
  0xc9   :  { %v57_v21 = vmin.f32 %v55_v19, 1.0  ;;  %v54_v22 = vmul.f32 %v277_v20, %v50_v16 }
  0xcb   :  { %v61_v23 = vsub.f32 1.0, %v57_v21  ;;  %v56_v24 = vmax.f32 %v54_v22, 1e-15  ;;  %v59_v27 = vadd.f32 1.0, %v57_v21 }
  0xcd   :  { %278 = vrcp.f32 %v61_v23  ;;  %v58_v25 = vmin.f32 %v56_v24, 1.0 }
  0xcf   :  { %v62_v26 = vsub.f32 1.0, %v58_v25  ;;  %v60_v30 = vadd.f32 1.0, %v58_v25 }
  0xd1   :  { %280 = vrcp.f32 %v62_v26 }
  0xd7   :  { %v279_v28 = vpop.eup %278 }
  0xd8   :  { %v64_v29 = vmul.f32 %v279_v28, %v59_v27 }
  0xda   :  { %282 = vlog2.f32 %v64_v29 }
  0xdb   :  { %v281_v31 = vpop.eup %280 }
  0xdc   :  { %v66_v32 = vmul.f32 %v281_v31, %v60_v30 }
  0xde   :  { %284 = vlog2.f32 %v66_v32 }
  0xe4   :  { %v283_v33 = vpop.eup %282 }
  0xe5   :  { %v68_v34 = vmul.f32 0.6931472, %v283_v33 }
  0xe7   :  { %v71_v35 = vmul.f32 0.5, %v68_v34 }
  0xe8   :  { %v285_v36 = vpop.eup %284 }
  0xe9   :  { %v70_v37 = vmul.f32 0.6931472, %v285_v36  ;;  %v73_v39 = vmul.f32 %v275_v17, %v71_v35 }
  0xeb   :  { %v72_v38 = vmul.f32 0.5, %v70_v37  ;;  %v75_v41 = vmul.f32 %v73_v39, %v409_v2 }
  0xed   :  { %v74_v40 = vmul.f32 %v277_v20, %v72_v38 }
  0xef   :  { %v76_v42 = vmul.f32 %v74_v40, %v411_v3 }
  0xf1   :  { %v77_v43 = vpack.c.bf16 %v76_v42, %v75_v41 }
  0xf3   :  { %254 = vmatmul.mubr.bf16.vlgmr.msra.gmra.mrb[0].mxu0 %v77_v43 }
 0x1c6   :  { %v176_v44 = vpop.f32.mrb[0].mxu0 }
 0x1c7   :  { %v255_v45 = vpop.f32.mrb[1].mxu0 }
 0x1c8   :  { %v179_v46 = vpop.f32.mrb[2].mxu0 }
 0x1c9   :  { %v226_v47 = vpack.c.bf16 %v179_v46, %v176_v44  ;;  %v256_v48 = vpop.f32.mrb[3].mxu0 }
 0x1cb   :  { %227 = vst [vmem:[#allocation7] sm:$0xff] %v226_v47  }
 0x1cc   :  { %341 = shalt.err (!%p338_p6)
}
 0x1cd   :  { %s342_s12 = scalar_lea.hbm %s436_s2, 128 }
 0x1ce   :  { %p343_p7 = scmp.ne.s32.totalorder %s436_s2, %s342_s12  ;;  %p346_p8 = scmp.lt.u32.totalorder %s342_s12, %s436_s2 }
 0x1d0   :  { %p348_p9 = pnand %p346_p8, %p343_p7 }
 0x1d2   :  { %351 = shalt.err (!%p348_p9)
}
 0x1d3   :  { %204 = dma.vmem_to_hbm [thread:$0]  %s199_s8, 128, %s436_s2, [#allocation4], %s362_s0, %s362_s0, %s363_s5  }
 0x1d4   :  { %356 = dma.done.wait [#allocation4], 128  }
 0x1d5   :  { %357 = vsyncadd [#allocation4], 4294967168 }
 0x1d6   :  { %208 = vsyncpa [#allocation3], 1 }
 0x1d7   :  { %209 = vsyncpa [#allocation6], 1 }
 0x1d8   :  { %210 = vsyncpa [#allocation4], 1 }

</bundles_post_ra>
